<compile_context>
chip_gen: v6e
topology: v6e:2x2x1
jax: 0.10.0
libtpu: 0.0.40
codegen_flags: <defaults>
</compile_context>

<pallas_src>
import functools

import jax
import jax.numpy as jnp
from jax import lax
from jax.experimental import pallas as pl
from jax.experimental.pallas import tpu as pltpu


def _round_up(x, m):
    return ((x + m - 1) // m) * m


def _coattn_kernel(v_ref, q_ref, wb_ref, wvt_ref, wqt_ref, whv_ref, whq_ref,
                   ww_ref, bw_ref, wh_ref, bh_ref, out_ref,
                   *, b_blk, t_pad, n_pad, t_valid, n_valid):
    """One grid step handles `b_blk` batch elements (fully batched, no per-element loop).

    v_ref : (b_blk*N_pad, d) bf16  image regions, zero-padded to N_pad, d on lanes
    q_ref : (b_blk*T_pad, d) bf16  question words, zero-padded to T_pad, d on lanes
    out_ref: (b_blk, A_pad)  f32   lane-dense padded logits
    """
    f32 = jnp.float32
    bf16 = jnp.bfloat16

    V2 = v_ref[...]                                   # (b*Np, d) bf16
    Q2 = q_ref[...]                                   # (b*Tp, d) bf16
    d = V2.shape[1]
    kdim = wvt_ref.shape[1]

    # --- batch folded into the MXU M dimension for the big projections ---
    QWb = jnp.dot(Q2, wb_ref[...], preferred_element_type=f32)    # (b*Tp, d)
    QW = jnp.dot(Q2, wqt_ref[...], preferred_element_type=f32)    # (b*Tp, k) == (Wq Q^T)^T
    VW = jnp.dot(V2, wvt_ref[...], preferred_element_type=f32)    # (b*Np, k) == (Wv V)^T

    # --- batched 3-D views. T_pad/N_pad are multiples of 16 (bf16 sublane tile),
    #     so these reshapes are layout no-ops (no hidden VMEM repacks). Casts are
    #     hoisted: one full-array bf16 cast each, never per-element. ---
    Q3 = Q2.reshape(b_blk, t_pad, d)                              # bf16
    V3 = V2.reshape(b_blk, n_pad, d)                              # bf16
    QWb3_16 = QWb.reshape(b_blk, t_pad, d).astype(bf16)
    QW3 = QW.reshape(b_blk, t_pad, kdim)                          # f32
    VW3 = VW.reshape(b_blk, n_pad, kdim)                          # f32
    QW3_16 = QW3.astype(bf16)
    VW3_16 = VW3.astype(bf16)

    # --- batched bilinear co-attention: every contraction is a canonical batched
    #     matmul (contract lhs last dim with rhs second-to-last / flash-attn form),
    #     so no XLU transposes and no M=1 matvecs are emitted.
    #     The affinity is computed in both orientations (cost is negligible) to
    #     keep both downstream contractions canonical. ---
    Ct = jnp.tanh(jnp.einsum('btd,bnd->btn', QWb3_16, V3,
                             preferred_element_type=f32))         # (b, Tp, Np)
    Cn = jnp.tanh(jnp.einsum('bnd,btd->bnt', V3, QWb3_16,
                             preferred_element_type=f32))         # (b, Np, Tp)
    Ct16 = Ct.astype(bf16)
    Cn16 = Cn.astype(bf16)

    # Hv^T = tanh((Wv V)^T + C^T (Wq Q^T)^T)  -> (b, Np, k)   (contract over T)
    HvT = jnp.tanh(VW3 + jnp.einsum('bnt,btk->bnk', Cn16, QW3_16,
                                    preferred_element_type=f32))
    # Hq^T = tanh((Wq Q^T)^T + C (Wv V)^T)    -> (b, Tp, k)   (contract over N)
    HqT = jnp.tanh(QW3 + jnp.einsum('btn,bnk->btk', Ct16, VW3_16,
                                    preferred_element_type=f32))

    # --- attention scores: VPU broadcast-mul + lane reduce (k is on the lane axis).
    #     Replaces the former M=1 MXU matvecs. ---
    sv = jnp.sum(HvT * whv_ref[...], axis=-1)                     # (b, Np)
    sq = jnp.sum(HqT * whq_ref[...], axis=-1)                     # (b, Tp)

    # --- masked, numerically stable softmax. Padded rows have score exactly 0
    #     (zero-padded inputs propagate to zero through every projection), so a
    #     simple 0/1 mask on exp() removes their contribution. ---
    n_mask = (lax.broadcasted_iota(jnp.int32, (b_blk, n_pad), 1) < n_valid).astype(f32)
    t_mask = (lax.broadcasted_iota(jnp.int32, (b_blk, t_pad), 1) < t_valid).astype(f32)
    ev = n_mask * jnp.exp(sv - jnp.max(sv, axis=-1, keepdims=True))
    eq = t_mask * jnp.exp(sq - jnp.max(sq, axis=-1, keepdims=True))
    av = ev * pl.reciprocal(jnp.sum(ev, axis=-1, keepdims=True), approx=True)
    aq = eq * pl.reciprocal(jnp.sum(eq, axis=-1, keepdims=True), approx=True)

    # --- attended features: broadcast-mul + sublane-axis reduce (VPU + XLU).
    #     Result stays register-resident; no VMEM scratch round-trip, no masked
    #     1-row stores. ---
    v_hat = jnp.sum(av[:, :, None] * V3.astype(f32), axis=1)      # (b, d)
    q_hat = jnp.sum(aq[:, :, None] * Q3.astype(f32), axis=1)      # (b, d)
    qv = (q_hat + v_hat).astype(bf16)                             # (b, d)

    # --- answer MLP on the whole batch block; lane-dense padded output ---
    fused = jnp.tanh(jnp.dot(qv, ww_ref[...],
                             preferred_element_type=f32) + bw_ref[...])
    out_ref[...] = jnp.dot(fused.astype(bf16), wh_ref[...],
                           preferred_element_type=f32) + bh_ref[...]   # (b, A_pad)


def coattention_forward(image, question_encoding, params, *, b_blk=None):
    """image: (B, d, H, W) NCHW; question_encoding: (B, T, d). Returns (B, A) f32 logits."""
    B, d, H, W = image.shape
    N = H * W
    T = question_encoding.shape[1]
    k = params["Wv"].shape[0]
    h = params["Ww"].shape[1]
    A = params["Wh"].shape[1]
    A_pad = _round_up(A, 128)     # lane-dense output width
    T_pad = _round_up(T, 16)      # bf16 sublane tile -> free in-kernel reshapes
    N_pad = _round_up(N, 16)

    if b_blk is None:
        # Bound per-step work; give the grid >= 2 steps when the batch allows it
        # (megacore sharding on v7x, DMA/compute pipelining everywhere).
        b_blk = 8 if (B > 8 and B % 8 == 0) else B
    assert B % b_blk == 0
    # NOTE: with b_blk < B, b_blk must be a multiple of 8 (f32 output/sublane tiling).

    # Lane-dense layouts: feature dim d last; batch folded into the row dimension;
    # T/N zero-padded to the bf16 sublane tile (softmax is masked in-kernel).
    V3 = jnp.transpose(image, (0, 2, 3, 1)).reshape(B, N, d)
    V3 = jnp.pad(V3, ((0, 0), (0, N_pad - N), (0, 0)))
    V2 = V3.reshape(B * N_pad, d).astype(jnp.bfloat16)
    Q3 = jnp.pad(question_encoding, ((0, 0), (0, T_pad - T), (0, 0)))
    Q2 = Q3.reshape(B * T_pad, d).astype(jnp.bfloat16)

    Wb = params["Wb"].astype(jnp.bfloat16)                 # (d, d)
    WvT = params["Wv"].T.astype(jnp.bfloat16)              # (d, k)
    WqT = params["Wq"].T.astype(jnp.bfloat16)              # (d, k)
    whv = params["whv"].astype(jnp.float32)                # (1, k)
    whq = params["whq"].astype(jnp.float32)                # (1, k)
    Ww = params["Ww"].astype(jnp.bfloat16)                 # (d, h)
    bw = params["bw"].astype(jnp.float32)                  # (1, h)
    Wh = jnp.pad(params["Wh"], ((0, 0), (0, A_pad - A))).astype(jnp.bfloat16)  # (h, A_pad)
    bh = jnp.pad(params["bh"], ((0, 0), (0, A_pad - A))).astype(jnp.float32)   # (1, A_pad)

    kernel = functools.partial(_coattn_kernel, b_blk=b_blk, t_pad=T_pad,
                               n_pad=N_pad, t_valid=T, n_valid=N)
    full = lambda shape: pl.BlockSpec(shape, lambda i: tuple(0 for _ in shape))

    out = pl.pallas_call(
        kernel,
        out_shape=jax.ShapeDtypeStruct((B, A_pad), jnp.float32),
        grid_spec=pltpu.PrefetchScalarGridSpec(
            num_scalar_prefetch=0,
            grid=(B // b_blk,),
            in_specs=[
                pl.BlockSpec((b_blk * N_pad, d), lambda i: (i, 0)),   # image regions
                pl.BlockSpec((b_blk * T_pad, d), lambda i: (i, 0)),   # question words
                full((d, d)),        # Wb
                full((d, k)),        # Wv^T
                full((d, k)),        # Wq^T
                full((1, k)),        # whv
                full((1, k)),        # whq
                full((d, h)),        # Ww
                full((1, h)),        # bw
                full((h, A_pad)),    # Wh (zero-padded, lane-dense)
                full((1, A_pad)),    # bh (zero-padded)
            ],
            out_specs=pl.BlockSpec((b_blk, A_pad), lambda i: (i, 0)),
        ),
        compiler_params=pltpu.CompilerParams(
            dimension_semantics=("parallel",),
            # Explicit scoped-VMEM budget: above the v5e (16 MiB) / v6e-v7x (32 MiB)
            # defaults, below v7x's 64 MiB physical per-TC limit.
            vmem_limit_bytes=48 * 1024 * 1024,
        ),
    )(V2, Q2, Wb, WvT, WqT, whv, whq, Ww, bw, Wh, bh)

    return out[:, :A]


def _reference_forward(image, question_encoding, params):
    """Pure-JAX f32 reference for sanity checking the kernel."""
    B, d, H, W = image.shape
    V = image.reshape(B, d, H * W)
    Q = question_encoding
    C = jnp.tanh(jnp.einsum("btd,de,ben->btn", Q, params["Wb"], V))
    WvV = jnp.einsum("kd,bdn->bkn", params["Wv"], V)
    WqQ = jnp.einsum("kd,btd->bkt", params["Wq"], Q)
    Hv = jnp.tanh(WvV + jnp.einsum("bkt,btn->bkn", WqQ, C))
    Hq = jnp.tanh(WqQ + jnp.einsum("bkn,btn->bkt", WvV, C))
    av = jax.nn.softmax(jnp.einsum("ik,bkn->bin", params["whv"], Hv), axis=-1)
    aq = jax.nn.softmax(jnp.einsum("ik,bkt->bit", params["whq"], Hq), axis=-1)
    v_hat = jnp.einsum("bin,bdn->bid", av, V)[:, 0]
    q_hat = jnp.einsum("bit,btd->bid", aq, Q)[:, 0]
    fused = jnp.tanh((q_hat + v_hat) @ params["Ww"] + params["bw"])
    return fused @ params["Wh"] + params["bh"]


def init_params(key, d, k, h, A):
    ks = jax.random.split(key, 9)
    scale = 0.1
    return {
        "Wb":  scale * jax.random.normal(ks[0], (d, d), jnp.float32),
        "Wv":  scale * jax.random.normal(ks[1], (k, d), jnp.float32),
        "Wq":  scale * jax.random.normal(ks[2], (k, d), jnp.float32),
        "whv": scale * jax.random.normal(ks[3], (1, k), jnp.float32),
        "whq": scale * jax.random.normal(ks[4], (1, k), jnp.float32),
        "Ww":  scale * jax.random.normal(ks[5], (d, h), jnp.float32),
        "bw":  jnp.zeros((1, h), jnp.float32),
        "Wh":  scale * jax.random.normal(ks[6], (h, A), jnp.float32),
        "bh":  jnp.zeros((1, A), jnp.float32),
    }


if __name__ == "__main__":
    # Small, module-consistent shapes.
    B, d, H, W = 2, 32, 4, 4     # image features (NCHW): B x d x 4 x 4 -> N = 16 regions
    T = 8                        # question length
    k, h, A = 32, 32, 32         # attention dim, hidden dim, number of answers

    key = jax.random.PRNGKey(0)
    k_img, k_q, k_p = jax.random.split(key, 3)
    image = jax.random.normal(k_img, (B, d, H, W), jnp.float32)
    question_encoding = jax.random.normal(k_q, (B, T, d), jnp.float32)
    params = init_params(k_p, d, k, h, A)

    logits = coattention_forward(image, question_encoding, params)
    logits = jax.block_until_ready(logits)
    assert logits.shape == (B, A)

    # Compare against the f32 reference evaluated on the same bf16-rounded operands
    # (kernel runs bf16-in / f32-accumulate, so use a bf16-appropriate tolerance).
    rnd = lambda x: x.astype(jnp.bfloat16).astype(jnp.float32)
    params_q = dict(params)
    for name in ("Wb", "Wv", "Wq", "Ww", "Wh"):
        params_q[name] = rnd(params[name])
    ref = _reference_forward(rnd(image), rnd(question_encoding), params_q)

    max_err = jnp.max(jnp.abs(logits - ref))
    assert jnp.allclose(logits, ref, atol=3e-2, rtol=3e-2), (
        f"kernel mismatch vs reference (max abs err {max_err})")

    print("KERNEL_OK")
</pallas_src>

<mosaic_0001>
module attributes {stable_mosaic.version = 11 : i64} {
  func.func @_coattn_kernel(%arg0: i32, %arg1: memref<32x32xbf16, #tpu.memory_space<vmem>>, %arg2: memref<32x32xbf16, #tpu.memory_space<vmem>>, %arg3: memref<32x32xbf16, #tpu.memory_space<vmem>>, %arg4: memref<32x32xbf16, #tpu.memory_space<vmem>>, %arg5: memref<32x32xbf16, #tpu.memory_space<vmem>>, %arg6: memref<1x32xf32, #tpu.memory_space<vmem>>, %arg7: memref<1x32xf32, #tpu.memory_space<vmem>>, %arg8: memref<32x32xbf16, #tpu.memory_space<vmem>>, %arg9: memref<1x32xf32, #tpu.memory_space<vmem>>, %arg10: memref<32x128xbf16, #tpu.memory_space<vmem>>, %arg11: memref<1x128xf32, #tpu.memory_space<vmem>>, %arg12: memref<2x128xf32, #tpu.memory_space<vmem>>) attributes {dimension_semantics = [#tpu.dimension_semantics<parallel>], iteration_bounds = array<i64: 1>, scalar_prefetch = 0 : i64, scratch_operands = 0 : i64, tpu.core_type = #tpu.core_type<tc>, window_params = [{transform_indices = @transform_0, window_bounds = array<i64: 32, 32>}, {transform_indices = @transform_1, window_bounds = array<i64: 32, 32>}, {pipeline_mode = #tpu.pipeline_mode<synchronous>, transform_indices = @transform_2, window_bounds = array<i64: 32, 32>}, {pipeline_mode = #tpu.pipeline_mode<synchronous>, transform_indices = @transform_3, window_bounds = array<i64: 32, 32>}, {pipeline_mode = #tpu.pipeline_mode<synchronous>, transform_indices = @transform_4, window_bounds = array<i64: 32, 32>}, {pipeline_mode = #tpu.pipeline_mode<synchronous>, transform_indices = @transform_5, window_bounds = array<i64: 1, 32>}, {pipeline_mode = #tpu.pipeline_mode<synchronous>, transform_indices = @transform_6, window_bounds = array<i64: 1, 32>}, {pipeline_mode = #tpu.pipeline_mode<synchronous>, transform_indices = @transform_7, window_bounds = array<i64: 32, 32>}, {pipeline_mode = #tpu.pipeline_mode<synchronous>, transform_indices = @transform_8, window_bounds = array<i64: 1, 32>}, {pipeline_mode = #tpu.pipeline_mode<synchronous>, transform_indices = @transform_9, window_bounds = array<i64: 32, 128>}, {pipeline_mode = #tpu.pipeline_mode<synchronous>, transform_indices = @transform_10, window_bounds = array<i64: 1, 128>}, {transform_indices = @transform_11, window_bounds = array<i64: 2, 128>}]} {
    %c0 = arith.constant 0 : index
    %c0_0 = arith.constant 0 : index
    %0 = vector.load %arg1[%c0, %c0_0] : memref<32x32xbf16, #tpu.memory_space<vmem>>, vector<32x32xbf16>
    %c0_1 = arith.constant 0 : index
    %c0_2 = arith.constant 0 : index
    %1 = vector.load %arg2[%c0_1, %c0_2] : memref<32x32xbf16, #tpu.memory_space<vmem>>, vector<32x32xbf16>
    %c0_3 = arith.constant 0 : index
    %c0_4 = arith.constant 0 : index
    %2 = vector.load %arg3[%c0_3, %c0_4] : memref<32x32xbf16, #tpu.memory_space<vmem>>, vector<32x32xbf16>
    %cst = arith.constant dense<0.000000e+00> : vector<32x32xf32>
    %3 = tpu.matmul %1, %2, %cst {dimension_numbers = #tpu.dot_dimension_numbers<[1], [0], [0], [1], [0, 0, 1, 1], [], []>} : vector<32x32xbf16>, vector<32x32xbf16>, vector<32x32xf32> -> vector<32x32xf32>
    %c0_5 = arith.constant 0 : index
    %c0_6 = arith.constant 0 : index
    %4 = vector.load %arg5[%c0_5, %c0_6] : memref<32x32xbf16, #tpu.memory_space<vmem>>, vector<32x32xbf16>
    %cst_7 = arith.constant dense<0.000000e+00> : vector<32x32xf32>
    %5 = tpu.matmul %1, %4, %cst_7 {dimension_numbers = #tpu.dot_dimension_numbers<[1], [0], [0], [1], [0, 0, 1, 1], [], []>} : vector<32x32xbf16>, vector<32x32xbf16>, vector<32x32xf32> -> vector<32x32xf32>
    %c0_8 = arith.constant 0 : index
    %c0_9 = arith.constant 0 : index
    %6 = vector.load %arg4[%c0_8, %c0_9] : memref<32x32xbf16, #tpu.memory_space<vmem>>, vector<32x32xbf16>
    %cst_10 = arith.constant dense<0.000000e+00> : vector<32x32xf32>
    %7 = tpu.matmul %0, %6, %cst_10 {dimension_numbers = #tpu.dot_dimension_numbers<[1], [0], [0], [1], [0, 0, 1, 1], [], []>} : vector<32x32xbf16>, vector<32x32xbf16>, vector<32x32xf32> -> vector<32x32xf32>
    %8 = vector.shape_cast %1 : vector<32x32xbf16> to vector<2x16x32xbf16>
    %9 = vector.shape_cast %0 : vector<32x32xbf16> to vector<2x16x32xbf16>
    %10 = vector.shape_cast %3 : vector<32x32xf32> to vector<2x16x32xf32>
    %11 = arith.truncf %10 : vector<2x16x32xf32> to vector<2x16x32xbf16>
    %12 = vector.shape_cast %5 : vector<32x32xf32> to vector<2x16x32xf32>
    %13 = vector.shape_cast %7 : vector<32x32xf32> to vector<2x16x32xf32>
    %14 = arith.truncf %12 : vector<2x16x32xf32> to vector<2x16x32xbf16>
    %15 = arith.truncf %13 : vector<2x16x32xf32> to vector<2x16x32xbf16>
    "tpu.trace_start"() <{level = 10 : i32, message = "btd,bnd->btn"}> : () -> ()
    %cst_11 = arith.constant dense<0.000000e+00> : vector<2x16x16xf32>
    %16 = tpu.matmul %11, %9, %cst_11 {dimension_numbers = #tpu.dot_dimension_numbers<[2], [2], [1], [1], [0, 0, 0, 1, 1, 1], [0], [0]>} : vector<2x16x32xbf16>, vector<2x16x32xbf16>, vector<2x16x16xf32> -> vector<2x16x16xf32>
    "tpu.trace_stop"() : () -> ()
    %17 = math.tanh %16 : vector<2x16x16xf32>
    "tpu.trace_start"() <{level = 10 : i32, message = "bnd,btd->bnt"}> : () -> ()
    %cst_12 = arith.constant dense<0.000000e+00> : vector<2x16x16xf32>
    %18 = tpu.matmul %9, %11, %cst_12 {dimension_numbers = #tpu.dot_dimension_numbers<[2], [2], [1], [1], [0, 0, 0, 1, 1, 1], [0], [0]>} : vector<2x16x32xbf16>, vector<2x16x32xbf16>, vector<2x16x16xf32> -> vector<2x16x16xf32>
    "tpu.trace_stop"() : () -> ()
    %19 = math.tanh %18 : vector<2x16x16xf32>
    %20 = arith.truncf %17 : vector<2x16x16xf32> to vector<2x16x16xbf16>
    %21 = arith.truncf %19 : vector<2x16x16xf32> to vector<2x16x16xbf16>
    "tpu.trace_start"() <{level = 10 : i32, message = "bnt,btk->bnk"}> : () -> ()
    %cst_13 = arith.constant dense<0.000000e+00> : vector<2x16x32xf32>
    %22 = tpu.matmul %21, %14, %cst_13 {dimension_numbers = #tpu.dot_dimension_numbers<[2], [1], [1], [2], [0, 0, 0, 1, 1, 2], [0], [0]>} : vector<2x16x16xbf16>, vector<2x16x32xbf16>, vector<2x16x32xf32> -> vector<2x16x32xf32>
    "tpu.trace_stop"() : () -> ()
    %23 = arith.addf %13, %22 : vector<2x16x32xf32>
    %24 = math.tanh %23 : vector<2x16x32xf32>
    "tpu.trace_start"() <{level = 10 : i32, message = "btn,bnk->btk"}> : () -> ()
    %cst_14 = arith.constant dense<0.000000e+00> : vector<2x16x32xf32>
    %25 = tpu.matmul %20, %15, %cst_14 {dimension_numbers = #tpu.dot_dimension_numbers<[2], [1], [1], [2], [0, 0, 0, 1, 1, 2], [0], [0]>} : vector<2x16x16xbf16>, vector<2x16x32xbf16>, vector<2x16x32xf32> -> vector<2x16x32xf32>
    "tpu.trace_stop"() : () -> ()
    %26 = arith.addf %12, %25 : vector<2x16x32xf32>
    %27 = math.tanh %26 : vector<2x16x32xf32>
    %c0_15 = arith.constant 0 : index
    %c0_16 = arith.constant 0 : index
    %28 = vector.load %arg6[%c0_15, %c0_16] : memref<1x32xf32, #tpu.memory_space<vmem>>, vector<1x32xf32>
    %29 = vector.shape_cast %28 : vector<1x32xf32> to vector<1x1x32xf32>
    %30 = vector.broadcast %29 : vector<1x1x32xf32> to vector<2x16x32xf32>
    %31 = arith.mulf %24, %30 : vector<2x16x32xf32>
    %cst_17 = arith.constant dense<0.000000e+00> : vector<2x16xf32>
    %32 = vector.multi_reduction <add>, %31, %cst_17 [2] : vector<2x16x32xf32> to vector<2x16xf32>
    %c0_18 = arith.constant 0 : index
    %c0_19 = arith.constant 0 : index
    %33 = vector.load %arg7[%c0_18, %c0_19] : memref<1x32xf32, #tpu.memory_space<vmem>>, vector<1x32xf32>
    %34 = vector.shape_cast %33 : vector<1x32xf32> to vector<1x1x32xf32>
    %35 = vector.broadcast %34 : vector<1x1x32xf32> to vector<2x16x32xf32>
    %36 = arith.mulf %27, %35 : vector<2x16x32xf32>
    %cst_20 = arith.constant dense<0.000000e+00> : vector<2x16xf32>
    %37 = vector.multi_reduction <add>, %36, %cst_20 [2] : vector<2x16x32xf32> to vector<2x16xf32>
    %38 = tpu.iota {dimensions = array<i32: 1>} : vector<2x16xi32>
    %c16_i32 = arith.constant 16 : i32
    %39 = vector.broadcast %c16_i32 : i32 to vector<2x16xi32>
    %40 = arith.cmpi slt, %38, %39 : vector<2x16xi32>
    %41 = arith.extui %40 : vector<2x16xi1> to vector<2x16xi32>
    %42 = arith.sitofp %41 : vector<2x16xi32> to vector<2x16xf32>
    %43 = tpu.iota {dimensions = array<i32: 1>} : vector<2x16xi32>
    %c8_i32 = arith.constant 8 : i32
    %44 = vector.broadcast %c8_i32 : i32 to vector<2x16xi32>
    %45 = arith.cmpi slt, %43, %44 : vector<2x16xi32>
    %46 = arith.extui %45 : vector<2x16xi1> to vector<2x16xi32>
    %47 = arith.sitofp %46 : vector<2x16xi32> to vector<2x16xf32>
    %cst_21 = arith.constant dense<0xFF800000> : vector<2xf32>
    %48 = vector.multi_reduction <maximumf>, %32, %cst_21 [1] : vector<2x16xf32> to vector<2xf32>
    %49 = vector.shape_cast %48 : vector<2xf32> to vector<2x1xf32>
    %50 = vector.broadcast %49 : vector<2x1xf32> to vector<2x16xf32>
    %51 = arith.subf %32, %50 : vector<2x16xf32>
    %52 = math.exp %51 : vector<2x16xf32>
    %53 = arith.mulf %42, %52 : vector<2x16xf32>
    %cst_22 = arith.constant dense<0xFF800000> : vector<2xf32>
    %54 = vector.multi_reduction <maximumf>, %37, %cst_22 [1] : vector<2x16xf32> to vector<2xf32>
    %55 = vector.shape_cast %54 : vector<2xf32> to vector<2x1xf32>
    %56 = vector.broadcast %55 : vector<2x1xf32> to vector<2x16xf32>
    %57 = arith.subf %37, %56 : vector<2x16xf32>
    %58 = math.exp %57 : vector<2x16xf32>
    %59 = arith.mulf %47, %58 : vector<2x16xf32>
    %cst_23 = arith.constant dense<0.000000e+00> : vector<2xf32>
    %60 = vector.multi_reduction <add>, %53, %cst_23 [1] : vector<2x16xf32> to vector<2xf32>
    %61 = vector.shape_cast %60 : vector<2xf32> to vector<2x1xf32>
    %62 = tpu.reciprocal %61 {approx = true} : vector<2x1xf32> -> vector<2x1xf32>
    %63 = vector.broadcast %62 : vector<2x1xf32> to vector<2x16xf32>
    %64 = arith.mulf %53, %63 : vector<2x16xf32>
    %cst_24 = arith.constant dense<0.000000e+00> : vector<2xf32>
    %65 = vector.multi_reduction <add>, %59, %cst_24 [1] : vector<2x16xf32> to vector<2xf32>
    %66 = vector.shape_cast %65 : vector<2xf32> to vector<2x1xf32>
    %67 = tpu.reciprocal %66 {approx = true} : vector<2x1xf32> -> vector<2x1xf32>
    %68 = vector.broadcast %67 : vector<2x1xf32> to vector<2x16xf32>
    %69 = arith.mulf %59, %68 : vector<2x16xf32>
    %70 = vector.shape_cast %64 : vector<2x16xf32> to vector<2x16x1xf32>
    %71 = arith.extf %9 : vector<2x16x32xbf16> to vector<2x16x32xf32>
    %72 = vector.broadcast %70 : vector<2x16x1xf32> to vector<2x16x32xf32>
    %73 = arith.mulf %72, %71 : vector<2x16x32xf32>
    %cst_25 = arith.constant dense<0.000000e+00> : vector<2x32xf32>
    %74 = vector.multi_reduction <add>, %73, %cst_25 [1] : vector<2x16x32xf32> to vector<2x32xf32>
    %75 = vector.shape_cast %69 : vector<2x16xf32> to vector<2x16x1xf32>
    %76 = arith.extf %8 : vector<2x16x32xbf16> to vector<2x16x32xf32>
    %77 = vector.broadcast %75 : vector<2x16x1xf32> to vector<2x16x32xf32>
    %78 = arith.mulf %77, %76 : vector<2x16x32xf32>
    %cst_26 = arith.constant dense<0.000000e+00> : vector<2x32xf32>
    %79 = vector.multi_reduction <add>, %78, %cst_26 [1] : vector<2x16x32xf32> to vector<2x32xf32>
    %80 = arith.addf %79, %74 : vector<2x32xf32>
    %81 = arith.truncf %80 : vector<2x32xf32> to vector<2x32xbf16>
    %c0_27 = arith.constant 0 : index
    %c0_28 = arith.constant 0 : index
    %82 = vector.load %arg8[%c0_27, %c0_28] : memref<32x32xbf16, #tpu.memory_space<vmem>>, vector<32x32xbf16>
    %cst_29 = arith.constant dense<0.000000e+00> : vector<2x32xf32>
    %83 = tpu.matmul %81, %82, %cst_29 {dimension_numbers = #tpu.dot_dimension_numbers<[1], [0], [0], [1], [0, 0, 1, 1], [], []>} : vector<2x32xbf16>, vector<32x32xbf16>, vector<2x32xf32> -> vector<2x32xf32>
    %c0_30 = arith.constant 0 : index
    %c0_31 = arith.constant 0 : index
    %84 = vector.load %arg9[%c0_30, %c0_31] : memref<1x32xf32, #tpu.memory_space<vmem>>, vector<1x32xf32>
    %85 = vector.broadcast %84 : vector<1x32xf32> to vector<2x32xf32>
    %86 = arith.addf %83, %85 : vector<2x32xf32>
    %87 = math.tanh %86 : vector<2x32xf32>
    %88 = arith.truncf %87 : vector<2x32xf32> to vector<2x32xbf16>
    %c0_32 = arith.constant 0 : index
    %c0_33 = arith.constant 0 : index
    %89 = vector.load %arg10[%c0_32, %c0_33] : memref<32x128xbf16, #tpu.memory_space<vmem>>, vector<32x128xbf16>
    %cst_34 = arith.constant dense<0.000000e+00> : vector<2x128xf32>
    %90 = tpu.matmul %88, %89, %cst_34 {dimension_numbers = #tpu.dot_dimension_numbers<[1], [0], [0], [1], [0, 0, 1, 1], [], []>} : vector<2x32xbf16>, vector<32x128xbf16>, vector<2x128xf32> -> vector<2x128xf32>
    %c0_35 = arith.constant 0 : index
    %c0_36 = arith.constant 0 : index
    %91 = vector.load %arg11[%c0_35, %c0_36] : memref<1x128xf32, #tpu.memory_space<vmem>>, vector<1x128xf32>
    %92 = vector.broadcast %91 : vector<1x128xf32> to vector<2x128xf32>
    %93 = arith.addf %90, %92 : vector<2x128xf32>
    %c0_37 = arith.constant 0 : index
    %c0_38 = arith.constant 0 : index
    %94 = vector.load %arg12[%c0_37, %c0_38] : memref<2x128xf32, #tpu.memory_space<vmem>>, vector<2x128xf32>
    tpu.vector_store %arg12[%c0_37, %c0_38], %93 {strides = array<i32>} : memref<2x128xf32, #tpu.memory_space<vmem>>, vector<2x128xf32>,
    return
  }
  func.func @transform_0(%arg0: i32) -> (i32, i32) {
    %c0_i32 = arith.constant 0 : i32
    %c0_i32_0 = arith.constant 0 : i32
    return %arg0, %c0_i32 : i32, i32
  }
  func.func @transform_1(%arg0: i32) -> (i32, i32) {
    %c0_i32 = arith.constant 0 : i32
    %c0_i32_0 = arith.constant 0 : i32
    return %arg0, %c0_i32 : i32, i32
  }
  func.func @transform_2(%arg0: i32) -> (i32, i32) {
    %c0_i32 = arith.constant 0 : i32
    %c0_i32_0 = arith.constant 0 : i32
    %c0_i32_1 = arith.constant 0 : i32
    return %c0_i32, %c0_i32_0 : i32, i32
  }
  func.func @transform_3(%arg0: i32) -> (i32, i32) {
    %c0_i32 = arith.constant 0 : i32
    %c0_i32_0 = arith.constant 0 : i32
    %c0_i32_1 = arith.constant 0 : i32
    return %c0_i32, %c0_i32_0 : i32, i32
  }
  func.func @transform_4(%arg0: i32) -> (i32, i32) {
    %c0_i32 = arith.constant 0 : i32
    %c0_i32_0 = arith.constant 0 : i32
    %c0_i32_1 = arith.constant 0 : i32
    return %c0_i32, %c0_i32_0 : i32, i32
  }
  func.func @transform_5(%arg0: i32) -> (i32, i32) {
    %c0_i32 = arith.constant 0 : i32
    %c0_i32_0 = arith.constant 0 : i32
    %c0_i32_1 = arith.constant 0 : i32
    return %c0_i32, %c0_i32_0 : i32, i32
  }
  func.func @transform_6(%arg0: i32) -> (i32, i32) {
    %c0_i32 = arith.constant 0 : i32
    %c0_i32_0 = arith.constant 0 : i32
    %c0_i32_1 = arith.constant 0 : i32
    return %c0_i32, %c0_i32_0 : i32, i32
  }
  func.func @transform_7(%arg0: i32) -> (i32, i32) {
    %c0_i32 = arith.constant 0 : i32
    %c0_i32_0 = arith.constant 0 : i32
    %c0_i32_1 = arith.constant 0 : i32
    return %c0_i32, %c0_i32_0 : i32, i32
  }
  func.func @transform_8(%arg0: i32) -> (i32, i32) {
    %c0_i32 = arith.constant 0 : i32
    %c0_i32_0 = arith.constant 0 : i32
    %c0_i32_1 = arith.constant 0 : i32
    return %c0_i32, %c0_i32_0 : i32, i32
  }
  func.func @transform_9(%arg0: i32) -> (i32, i32) {
    %c0_i32 = arith.constant 0 : i32
    %c0_i32_0 = arith.constant 0 : i32
    %c0_i32_1 = arith.constant 0 : i32
    return %c0_i32, %c0_i32_0 : i32, i32
  }
  func.func @transform_10(%arg0: i32) -> (i32, i32) {
    %c0_i32 = arith.constant 0 : i32
    %c0_i32_0 = arith.constant 0 : i32
    %c0_i32_1 = arith.constant 0 : i32
    return %c0_i32, %c0_i32_0 : i32, i32
  }
  func.func @transform_11(%arg0: i32) -> (i32, i32) {
    %c0_i32 = arith.constant 0 : i32
    %c0_i32_0 = arith.constant 0 : i32
    return %arg0, %c0_i32 : i32, i32
  }
}

</mosaic_0001>

<bundles_post_ra>
// kernel: tpu_custom_call.1
= control target key start
LH: loop header
LB: loop body
LE: loop exit
PB: predicated region body
PF: predicated region fallthrough
CT: control target
= control target key end

     0   :  { %16 = vsyncpa [#allocation3], 0  ;;  %s2037_s0 = inlined_call_operand.hbm [shape: bf16[32,32], index: 0, kind: input, shape index: {}]   ;;  %s2038_s1 = inlined_call_operand.hbm [shape: bf16[32,32], index: 1, kind: input, shape index: {}]   ;;  %s2039_s2 = inlined_call_operand.hbm [shape: bf16[32,32], index: 2, kind: input, shape index: {}]   ;;  %s2040_s3 = inlined_call_operand.hbm [shape: bf16[32,32], index: 3, kind: input, shape index: {}]   ;;  %s2041_s4 = inlined_call_operand.hbm [shape: bf16[32,32], index: 4, kind: input, shape index: {}]   ;;  %s2042_s5 = inlined_call_operand.hbm [shape: f32[1,32], index: 5, kind: input, shape index: {}]   ;;  %s2043_s6 = inlined_call_operand.hbm [shape: f32[1,32], index: 6, kind: input, shape index: {}]   ;;  %s2044_s7 = inlined_call_operand.hbm [shape: bf16[32,32], index: 7, kind: input, shape index: {}]   ;;  %s2045_s8 = inlined_call_operand.hbm [shape: f32[1,32], index: 8, kind: input, shape index: {}]   ;;  %s2046_s9 = inlined_call_operand.vmem [shape: bf16[32,128], index: 9, kind: input, shape index: {}]   ;;  %s2047_s10 = inlined_call_operand.vmem [shape: f32[1,128], index: 10, kind: input, shape index: {}]   ;;  %s2048_s11 = inlined_call_operand.hbm [shape: f32[2,128], index: 11, kind: output, shape index: {}]  }
   0x1   :  { %17 = vsyncpa [#allocation6], 0 }
   0x2   :  { %18 = vsyncpa [#allocation9], 0 }
   0x3   :  { %19 = vsyncpa [#allocation12], 0 }
   0x4   :  { %20 = vsyncpa [#allocation15], 0 }
   0x5   :  { %21 = vsyncpa [#allocation4], 0  ;;  %s1734_s17 = smov [#allocation5]   ;;  %s1735_s19 = smov [#allocation8]  }
   0x6   :  { %s39_s18 = sshll.u32 %s1734_s17, 4  ;;  %s63_s20 = sshll.u32 %s1735_s19, 4  ;;  %s40_s18 = int_to_ptr.vmem [resolvable:$true] %s39_s18  ;;  %s64_s20 = int_to_ptr.vmem [resolvable:$true] %s63_s20 }
   0x7   :  { %s1530_s21 = scalar_lea.vmem %s40_s18, 256  ;;  %p1535_p1 = scmp.lt.s32.totalorder %s40_s18, %s40_s18 }
   0x8   :  { %p1531_p0 = scmp.ne.s32.totalorder %s40_s18, %s1530_s21  ;;  %p1536_p2 = scmp.lt.s32.totalorder %s1530_s21, %s1530_s21 }
   0xa   :  { %p1537_p3 = por %p1536_p2, %p1535_p1 }
   0xc   :  { %p1538_p4 = pnand %p1537_p3, %p1531_p0 }
   0xe   :  { %1541 = shalt.err (!%p1538_p4)
}
   0xf   :  { %s1736_s22 = smov 64   ;;  %s1737_s23 = smov 4  }
  0x10   :  { %45 = dma.hbm_to_vmem [thread:$0]  %s2038_s1, 256, %s40_s18, [#allocation6], %s1736_s22, %s1736_s22, %s1737_s23  }
  0x11   :  { %s1550_s26 = scalar_lea.vmem %s64_s20, 256  ;;  %p1555_p6 = scmp.lt.s32.totalorder %s64_s20, %s64_s20 }
  0x12   :  { %p1551_p5 = scmp.ne.s32.totalorder %s64_s20, %s1550_s26  ;;  %p1556_p7 = scmp.lt.s32.totalorder %s1550_s26, %s1550_s26 }
  0x14   :  { %p1557_p8 = por %p1556_p7, %p1555_p6 }
  0x16   :  { %p1558_p9 = pnand %p1557_p8, %p1551_p5 }
  0x18   :  { %1561 = shalt.err (!%p1558_p9)
}
  0x19   :  { %69 = dma.hbm_to_vmem [thread:$0]  %s2040_s3, 256, %s64_s20, [#allocation9], %s1736_s22, %s1736_s22, %s1737_s23  }
  0x1a   :  { %s1738_s29 = smov [#allocation11]   ;;  %s1739_s12 = smov [#allocation14]  }
  0x1b   :  { %s88_s30 = sshll.u32 %s1738_s29, 4  ;;  %s107_s13 = sshll.u32 %s1739_s12, 4  ;;  %s89_s30 = int_to_ptr.vmem [resolvable:$true] %s88_s30  ;;  %s108_s13 = int_to_ptr.vmem [resolvable:$true] %s107_s13 }
  0x1c   :  { %s1570_s1 = scalar_lea.vmem %s89_s30, 16  ;;  %s1574_s14 = scalar_lea.vmem %s89_s30, 32 }
  0x1d   :  { %p1571_p10 = scmp.ne.s32.totalorder %s89_s30, %s1570_s1  ;;  %p1575_p11 = scmp.lt.s32.totalorder %s89_s30, %s89_s30 }
  0x1e   :  { %p1576_p12 = scmp.lt.s32.totalorder %s1574_s14, %s1570_s1 }
  0x20   :  { %p1577_p13 = por %p1576_p12, %p1575_p11 }
  0x22   :  { %p1578_p0 = pnand %p1577_p13, %p1571_p10 }
  0x24   :  { %1581 = shalt.err (!%p1578_p0)
}
  0x25   :  { %91 = dma.hbm_to_vmem [thread:$0]  %s2042_s5, 16, %s89_s30, [#allocation12]  }
  0x26   :  { %s1590_s17 = scalar_lea.vmem %s108_s13, 256  ;;  %p1595_p2 = scmp.lt.s32.totalorder %s108_s13, %s108_s13 }
  0x27   :  { %p1591_p1 = scmp.ne.s32.totalorder %s108_s13, %s1590_s17  ;;  %p1596_p3 = scmp.lt.s32.totalorder %s1590_s17, %s1590_s17 }
  0x29   :  { %p1597_p4 = por %p1596_p3, %p1595_p2 }
  0x2b   :  { %p1598_p5 = pnand %p1597_p4, %p1591_p1 }
  0x2d   :  { %1601 = shalt.err (!%p1598_p5)
}
  0x2e   :  { %113 = dma.hbm_to_vmem [thread:$0]  %s2044_s7, 256, %s108_s13, [#allocation15], %s1736_s22, %s1736_s22, %s1737_s23  }
  0x2f   :  { %s1740_s19 = smov [#allocation2]   ;;  %s1741_s21 = smov [#allocation7]  }
  0x30   :  { %s27_s20 = sshll.u32 %s1740_s19, 4  ;;  %s51_s24 = sshll.u32 %s1741_s21, 4  ;;  %s28_s20 = int_to_ptr.vmem [resolvable:$true] %s27_s20  ;;  %s52_s24 = int_to_ptr.vmem [resolvable:$true] %s51_s24 }
  0x31   :  { %s1610_s5 = scalar_lea.vmem %s28_s20, 256  ;;  %p1615_p7 = scmp.lt.s32.totalorder %s28_s20, %s28_s20 }
  0x32   :  { %p1611_p6 = scmp.ne.s32.totalorder %s28_s20, %s1610_s5  ;;  %p1616_p8 = scmp.lt.s32.totalorder %s1610_s5, %s1610_s5 }
  0x34   :  { %p1617_p9 = por %p1616_p8, %p1615_p7 }
  0x36   :  { %p1618_p10 = pnand %p1617_p9, %p1611_p6 }
  0x38   :  { %1621 = shalt.err (!%p1618_p10)
}
  0x39   :  { %33 = dma.hbm_to_vmem [thread:$0]  %s2037_s0, 256, %s28_s20, [#allocation3], %s1736_s22, %s1736_s22, %s1737_s23  }
  0x3a   :  { %s1630_s7 = scalar_lea.vmem %s52_s24, 256  ;;  %p1635_p12 = scmp.lt.s32.totalorder %s52_s24, %s52_s24 }
  0x3b   :  { %p1631_p11 = scmp.ne.s32.totalorder %s52_s24, %s1630_s7  ;;  %p1636_p13 = scmp.lt.s32.totalorder %s1630_s7, %s1630_s7 }
  0x3d   :  { %p1637_p0 = por %p1636_p13, %p1635_p12 }
  0x3f   :  { %p1638_p1 = pnand %p1637_p0, %p1631_p11 }
  0x41   :  { %1641 = shalt.err (!%p1638_p1)
}
  0x42   :  { %57 = dma.hbm_to_vmem [thread:$0]  %s2039_s2, 256, %s52_s24, [#allocation6], %s1736_s22, %s1736_s22, %s1737_s23  }
  0x43   :  { %s1742_s29 = smov [#allocation10]   ;;  %s1743_s12 = smov [#allocation13]  }
  0x44   :  { %s75_s30 = sshll.u32 %s1742_s29, 4  ;;  %s98_s13 = sshll.u32 %s1743_s12, 4  ;;  %s76_s30 = int_to_ptr.vmem [resolvable:$true] %s75_s30  ;;  %s99_s13 = int_to_ptr.vmem [resolvable:$true] %s98_s13 }
  0x45   :  { %s1650_s0 = scalar_lea.vmem %s76_s30, 256  ;;  %p1655_p3 = scmp.lt.s32.totalorder %s76_s30, %s76_s30 }
  0x46   :  { %p1651_p2 = scmp.ne.s32.totalorder %s76_s30, %s1650_s0  ;;  %p1656_p4 = scmp.lt.s32.totalorder %s1650_s0, %s1650_s0 }
  0x48   :  { %p1657_p5 = por %p1656_p4, %p1655_p3 }
  0x4a   :  { %p1658_p6 = pnand %p1657_p5, %p1651_p2 }
  0x4c   :  { %1661 = shalt.err (!%p1658_p6)
}
  0x4d   :  { %81 = dma.hbm_to_vmem [thread:$0]  %s2041_s4, 256, %s76_s30, [#allocation9], %s1736_s22, %s1736_s22, %s1737_s23  }
  0x4e   :  { %s1670_s2 = scalar_lea.vmem %s99_s13, 16  ;;  %s1674_s15 = scalar_lea.vmem %s99_s13, 32 }
  0x4f   :  { %p1671_p7 = scmp.ne.s32.totalorder %s99_s13, %s1670_s2  ;;  %p1675_p8 = scmp.lt.s32.totalorder %s99_s13, %s99_s13 }
  0x50   :  { %p1676_p9 = scmp.lt.s32.totalorder %s1674_s15, %s1670_s2 }
  0x52   :  { %p1677_p10 = por %p1676_p9, %p1675_p8 }
  0x54   :  { %p1678_p11 = pnand %p1677_p10, %p1671_p7 }
  0x56   :  { %1681 = shalt.err (!%p1678_p11)
}
  0x57   :  { %101 = dma.hbm_to_vmem [thread:$0]  %s2043_s6, 16, %s99_s13, [#allocation12]  }
  0x58   :  { %s1744_s3 = smov [#allocation16]  }
  0x59   :  { %s120_s18 = sshll.u32 %s1744_s3, 4  ;;  %s121_s18 = int_to_ptr.vmem [resolvable:$true] %s120_s18 }
  0x5a   :  { %s1690_s19 = scalar_lea.vmem %s121_s18, 16  ;;  %s1694_s20 = scalar_lea.vmem %s121_s18, 32 }
  0x5b   :  { %p1691_p12 = scmp.ne.s32.totalorder %s121_s18, %s1690_s19  ;;  %p1695_p13 = scmp.lt.s32.totalorder %s121_s18, %s121_s18 }
  0x5c   :  { %p1696_p0 = scmp.lt.s32.totalorder %s1694_s20, %s1690_s19 }
  0x5e   :  { %p1697_p1 = por %p1696_p0, %p1695_p13 }
  0x60   :  { %p1698_p2 = pnand %p1697_p1, %p1691_p12 }
  0x62   :  { %1701 = shalt.err (!%p1698_p2)
}
  0x63   :  { %123 = dma.hbm_to_vmem [thread:$0]  %s2045_s8, 16, %s121_s18, [#allocation15]  }
  0x64   :  { %1722 = dma.done.wait [#allocation3], 256  }
  0x65   :  { %1723 = vsyncadd [#allocation3], 4294967040 }
  0x66   :  { %1724 = dma.done.wait [#allocation6], 512  }
  0x67   :  { %1725 = vsyncadd [#allocation6], 4294966784 }
  0x68   :  { %1726 = dma.done.wait [#allocation9], 512  }
  0x69   :  { %1727 = vsyncadd [#allocation9], 4294966784 }
  0x6a   :  { %1728 = dma.done.wait [#allocation12], 32  }
  0x6b   :  { %1729 = vsyncadd [#allocation12], 4294967264 }
  0x6c   :  { %1730 = dma.done.wait [#allocation15], 272  }
  0x6d   :  { %1731 = vsyncadd [#allocation15], 4294967024  ;;  %v1450_v0 = vld [vmem:[#allocation7 + $0x8] sm:$0xff]   ;;  %v1451_v1 = vld [vmem:[#allocation7] sm:$0xff]   ;;  %vm190_vm0 = vcmask 261120   ;;  %v1745_v10 = vmov 0.0  }
  0x6e   :  { %1345 = vmatprep.subr.bf16.mxu0 %v1450_v0  ;;  %v1854_v2 = vld [vmem:[#allocation5] sm:$0xff]   ;;  %v1856_v3 = vld [vmem:[#allocation5 + $0x8] sm:$0xff]   ;;  %v1454_v4 = vld [vmem:[#allocation10 + $0x8] sm:$0xff]   ;;  %vm1746_vm1 = vmmov 0   ;;  %vm580_vm2 = vcmask 130048   ;;  %vm840_vm3 = vcmask 130112  }
  0x6f   :  { %1346 = vmatpush3.bf16.msra.mxu0 %v1450_v0  ;;  %v1455_v5 = vld [vmem:[#allocation8 + $0x8] sm:$0xff]   ;;  %1349 = vmatprep.mubr.msk.bf16.mxu0 %vm190_vm0, %v1854_v2  ;;  %v1456_v6 = vld [vmem:[#allocation10] sm:$0xff]   ;;  %v1457_v8 = vld [vmem:[#allocation8] sm:$0xff]   ;;  %vm851_vm4 = vcmask 1041409   ;;  %vm854_vm5 = vcmask 123904   ;;  %s1748_s25 = smov [#allocation17]  }
  0x70   :  { %1347 = vmatprep.subr.bf16.mxu0 %v1451_v1  ;;  %1353 = vmatprep.subr.bf16.mxu1 %v1454_v4  ;;  %v1862_v7 = vld [vmem:[#allocation2] sm:$0xff]   ;;  %v1868_v9 = vld [vmem:[#allocation2 + $0x8] sm:$0xff]   ;;  %s1262_s26 = sshll.u32 %s1748_s25, 4  ;;  %s1263_s26 = int_to_ptr.vmem [resolvable:$true] %s1262_s26 }
  0x71   :  { %1354 = vmatpush3.bf16.msra.mxu1 %v1454_v4  ;;  %1357 = vmatprep.mubr.msk.bf16.mxu1 %vm190_vm0, %v1854_v2  ;;  %v341_v11 = vsel %vm190_vm0, %v1868_v9, 0  ;;  %v338_v12 = vsel %vm190_vm0, %v1862_v7, 0  ;;  %p1707_p4 = scmp.lt.s32.totalorder %s1263_s26, %s1263_s26 }
  0x72   :  { %1355 = vmatprep.subr.bf16.mxu1 %v1456_v6 }
  0x73   :  { %1348 = vmatpush3.bf16.msra.mxu0 %v1451_v1 }
  0x74   :  { %1361 = vmatprep.subr.bf16.mxu0 %v1455_v5 }
  0x75   :  { %1356 = vmatpush3.bf16.msra.mxu1 %v1456_v6 }
  0x76   :  { %1350 = vmatmul.mubr.msk.bf16.vlgmr.msra.gmra.mxu0 %vm190_vm0, %v1856_v3  ;;  %1369 = vmatprep.subr.bf16.mxu1 %v1745_v10 }
  0x77   :  { %1362 = vmatpush3.bf16.msra.mxu0 %v1455_v5  ;;  %1365 = vmatprep.mubr.msk.bf16.mxu0 %vm190_vm0, %v1862_v7 }
  0x78   :  { %1363 = vmatprep.subr.bf16.mxu0 %v1457_v8  ;;  %1358 = vmatmul.mubr.msk.bf16.vlgmr.msra.gmra.mxu1 %vm190_vm0, %v1856_v3 }
  0x79   :  { %1370 = vmatpush3.bf16.xpose.msra.mxu1 %v338_v12  ;;  %1371 = vmatprep.mubr.msk.bf16.mxu1 %vm1746_vm1, %v1745_v10 }
  0x7a   :  { %1381 = vmatprep.subr.bf16.mxu1 %v1745_v10 }
  0x7b   :  { %1364 = vmatpush3.bf16.msra.mxu0 %v1457_v8 }
  0x7c   :  { %1375 = vmatprep.subr.bf16.mxu0 %v1745_v10 }
  0x7e   :  { %1366 = vmatmul.mubr.msk.bf16.vlgmr.msra.gmra.mxu0 %vm190_vm0, %v1868_v9 }
  0x7f   :  { %1376 = vmatpush3.bf16.xpose.msra.mxu0 %v341_v11  ;;  %1377 = vmatprep.mubr.msk.bf16.mxu0 %vm1746_vm1, %v1745_v10 }
  0x80   :  { %1387 = vmatprep.subr.bf16.mxu0 %v1745_v10 }
 0x136   :  { %v1351_v13 = vpop.f32.mrf.mxu0 }
 0x138   :  { %v231_v14 = vpop.f32.mrf.mxu0  ;;  %v1886_v15 = vpop.f32.mrf.mxu1 }
 0x13a   :  { %v1352_v16 = vpop.f32.mrf.mxu0  ;;  %v1888_v18 = vpop.f32.mrf.mxu1 }
 0x13b   :  { %v393_v17 = vpack.c.bf16 %v1352_v16, %v1351_v13 }
 0x13c   :  { %v234_v19 = vpop.f32.mrf.mxu0  ;;  %v1892_v22 = vpop.f32.mrf.mxu1 }
 0x13d   :  { %v443_v20 = vsel %vm190_vm0, %v393_v17, 0  ;;  %v392_v21 = vpack.c.bf16 %v234_v19, %v231_v14  ;;  %1378 = vmatmul.mubr.msk.bf16.vlgmr.msra.gmra.mxu0 %vm190_vm0, %v393_v17  ;;  %v395_v25 = vpack.c.bf16 %v1892_v22, %v1886_v15 }
 0x13e   :  { %1388 = vmatpush3.bf16.xpose.msra.mxu0 %v443_v20  ;;  %1389 = vmatprep.mubr.msk.bf16.mxu0 %vm1746_vm1, %v1745_v10  ;;  %v1901_v24 = vpop.f32.mrf.mxu1  ;;  %v1367_v27 = vpop.f32.mrf.mxu0 }
 0x13f   :  { %v399_v23 = vsel %vm190_vm0, %v392_v21, 0  ;;  %1372 = vmatmul.mubr.msk.bf16.vlgmr.msra.gmra.mxu1 %vm190_vm0, %v392_v21  ;;  %1399 = vmatprep.subr.bf16.mxu0 %v1745_v10  ;;  %v394_v26 = vpack.c.bf16 %v1901_v24, %v1888_v18 }
 0x140   :  { %1382 = vmatpush3.bf16.xpose.msra.mxu1 %v399_v23  ;;  %1383 = vmatprep.mubr.msk.bf16.mxu1 %vm1746_vm1, %v1745_v10  ;;  %v377_v28 = vpop.f32.mrf.mxu0 }
 0x141   :  { %1393 = vmatprep.subr.bf16.mxu1 %v1745_v10 }
 0x142   :  { %v1368_v29 = vpop.f32.mrf.mxu0 }
 0x143   :  { %v397_v52 = vpack.c.bf16 %v1368_v29, %v1367_v27 }
 0x144   :  { %v1918_v30 = vpop.f32.mrf.mxu0 }
 0x145   :  { %1390 = vmatmul.mubr.msk.bf16.vlgmr.msra.gmra.mxu0 %vm190_vm0, %v1868_v9  ;;  %v396_v54 = vpack.c.bf16 %v1918_v30, %v377_v28 }
 0x146   :  { %1400 = vmatpush3.bf16.msra.mxu0 %v395_v25  ;;  %1401 = vmatprep.mubr.msk.bf16.mxu0 %vm1746_vm1, %v1745_v10 }
 0x147   :  { %1384 = vmatmul.mubr.msk.bf16.vlgmr.msra.gmra.mxu1 %vm190_vm0, %v1862_v7  ;;  %1411 = vmatprep.subr.bf16.mxu0 %v1745_v10 }
 0x148   :  { %1394 = vmatpush3.bf16.msra.mxu1 %v394_v26  ;;  %1395 = vmatprep.mubr.msk.bf16.mxu1 %vm1746_vm1, %v1745_v10 }
 0x149   :  { %1405 = vmatprep.subr.bf16.mxu1 %v1745_v10 }
 0x1fd   :  { %v479_v31 = vpop.f32.mrf.mxu0 }
 0x1ff   :  { %v435_v32 = vpop.f32.mrf.mxu1  ;;  %v1379_v33 = vpop.f32.mrf.mxu0 }
 0x201   :  { %v1373_v34 = vpop.f32.mrf.mxu1  ;;  %v482_v35 = vpop.f32.mrf.mxu0 }
 0x203   :  { %v438_v36 = vpop.f32.mrf.mxu1  ;;  %v1380_v37 = vpop.f32.mrf.mxu0 }
 0x205   :  { %v1374_v38 = vpop.f32.mrf.mxu1  ;;  %v565_v39 = vpop.f32.mrf.mxu0 }
 0x206   :  { %1468 = vtanh.f32 %v565_v39 }
 0x207   :  { %v524_v40 = vpop.f32.mrf.mxu1  ;;  %v1391_v41 = vpop.f32.mrf.mxu0 }
 0x208   :  { %v1300_v41 = vld [vmem:[#allocation13] ss:$0 sm:$0xff] }
 0x209   :  { %v1385_v42 = vpop.f32.mrf.mxu1  ;;  %v568_v43 = vpop.f32.mrf.mxu0 }
 0x20a   :  { %1470 = vtanh.f32 %v568_v43 }
 0x20b   :  { %1472 = vtanh.f32 %v524_v40  ;;  %v527_v44 = vpop.f32.mrf.mxu1  ;;  %v1392_v45 = vpop.f32.mrf.mxu0 }
 0x20c   :  { %1474 = vtanh.f32 %v527_v44 }
 0x20d   :  { %v1386_v46 = vpop.f32.mrf.mxu1  ;;  %1476 = vtanh.f32 %v482_v35 }
 0x20e   :  { %1478 = vtanh.f32 %v479_v31 }
 0x20f   :  { %1480 = vtanh.f32 %v438_v36 }
 0x210   :  { %1482 = vtanh.f32 %v435_v32 }
 0x213   :  { %v1469_v47 = vpop.eup %1468 }
 0x217   :  { %v1471_v48 = vpop.eup %1470 }
 0x218   :  { %v1473_v49 = vpop.eup %1472  ;;  %v579_v50 = vpack.c.bf16 %v1471_v48, %v1469_v47 }
 0x219   :  { %v1475_v51 = vpop.eup %1474 }
 0x21a   :  { %1402 = vmatmul.mubr.msk.bf16.vlgmr.msra.gmra.mxu0 %vm580_vm2, %v579_v50  ;;  %v578_v53 = vpack.c.bf16 %v1475_v51, %v1473_v49  ;;  %v1477_v55 = vpop.eup %1476 }
 0x21b   :  { %1412 = vmatpush3.bf16.msra.mxu0 %v397_v52  ;;  %1413 = vmatprep.mubr.msk.bf16.mxu0 %vm1746_vm1, %v1745_v10  ;;  %v1479_v56 = vpop.eup %1478  ;;  %v819_v52 = vlaneseq }
 0x21c   :  { %1396 = vmatmul.mubr.msk.bf16.vlgmr.msra.gmra.mxu1 %vm580_vm2, %v578_v53  ;;  %1425 = vmatprep.subr.bf16.mxu0 %v1745_v10  ;;  %v1481_v57 = vpop.eup %1480  ;;  %v577_v58 = vpack.c.bf16 %v1477_v55, %v1479_v56 }
 0x21d   :  { %1406 = vmatpush3.bf16.msra.mxu1 %v396_v54  ;;  %1407 = vmatprep.mubr.msk.bf16.mxu1 %vm1746_vm1, %v1745_v10  ;;  %v1483_v59 = vpop.eup %1482  ;;  %v1948_v53 = vand.u32 127, %v819_v52  ;;  %v832_v55 = vshrl.u32 %v819_v52, 7 }
 0x21e   :  { %1417 = vmatprep.subr.bf16.mxu1 %v1745_v10  ;;  %v576_v60 = vpack.c.bf16 %v1481_v57, %v1483_v59 }
 0x21f   :  { %v835_v54 = vadd.s32 4294967288, %v1948_v53  ;;  %v1954_v59 = vsub.s32 %v1948_v53, %v832_v55  ;;  %vm821_vm6 = vcmp.lt.s32.totalorder %v1948_v53, 16  ;;  %vm824_vm7 = vcmp.lt.s32.totalorder %v1948_v53, 8 }
 0x221   :  { %v1951_v57 = vsub.s32 %v835_v54, %v832_v55 }
 0x222   :  { %1414 = vmatmul.mubr.msk.bf16.vlgmr.msra.gmra.mxu0 %vm580_vm2, %v577_v58 }
 0x223   :  { %1429 = vmatprep.mubr.msk.bf16.mxu0 %vm1746_vm1, %v1745_v10 }
 0x224   :  { %1408 = vmatmul.mubr.msk.bf16.vlgmr.msra.gmra.mxu1 %vm580_vm2, %v576_v60 }
 0x225   :  { %1421 = vmatprep.mubr.msk.bf16.mxu1 %vm1746_vm1, %v1745_v10 }
 0x2da   :  { %v662_v61 = vpop.f32.mrf.mxu0 }
 0x2db   :  { %v671_v62 = vadd.f32 %v1367_v27, %v662_v61 }
 0x2dc   :  { %v618_v63 = vpop.f32.mrf.mxu1  ;;  %v1403_v0 = vpop.f32.mrf.mxu0 }
 0x2dd   :  { %1484 = vtanh.f32 %v671_v62  ;;  %v669_v1 = vadd.f32 %v618_v63, %v377_v28  ;;  %v1299_v28 = vld [vmem:[#allocation11] ss:$0 sm:$0xff] }
 0x2de   :  { %v1397_v4 = vpop.f32.mrf.mxu1  ;;  %v665_v5 = vpop.f32.mrf.mxu0 }
 0x2df   :  { %1486 = vtanh.f32 %v669_v1  ;;  %v672_v6 = vadd.f32 %v1368_v29, %v665_v5 }
 0x2e0   :  { %v621_v8 = vpop.f32.mrf.mxu1  ;;  %v1404_v11 = vpop.f32.mrf.mxu0 }
 0x2e1   :  { %1488 = vtanh.f32 %v672_v6  ;;  %v670_v12 = vadd.f32 %v621_v8, %v1918_v30 }
 0x2e2   :  { %v1398_v13 = vpop.f32.mrf.mxu1  ;;  %v758_v14 = vpop.f32.mrf.mxu0 }
 0x2e3   :  { %1490 = vtanh.f32 %v670_v12  ;;  %v767_v16 = vadd.f32 %v1886_v15, %v758_v14 }
 0x2e4   :  { %v714_v17 = vpop.f32.mrf.mxu1  ;;  %v1415_v19 = vpop.f32.mrf.mxu0 }
 0x2e5   :  { %v765_v20 = vadd.f32 %v714_v17, %v1888_v18  ;;  %1492 = vtanh.f32 %v767_v16 }
 0x2e6   :  { %v1409_v21 = vpop.f32.mrf.mxu1  ;;  %v761_v23 = vpop.f32.mrf.mxu0 }
 0x2e7   :  { %1494 = vtanh.f32 %v765_v20  ;;  %v768_v25 = vadd.f32 %v1892_v22, %v761_v23 }
 0x2e8   :  { %v717_v26 = vpop.f32.mrf.mxu1  ;;  %v1416_v27 = vpop.f32.mrf.mxu0 }
 0x2e9   :  { %v766_v29 = vadd.f32 %v717_v26, %v1901_v24  ;;  %1496 = vtanh.f32 %v768_v25  ;;  %v1747_v27 = vmov 0  }
 0x2ea   :  { %v1485_v30 = vpop.eup %1484  ;;  %v1410_v31 = vpop.f32.mrf.mxu1  ;;  %1449 = vset.pattern.permute.xlu1 %v1747_v27  ;;  %1448 = vset.pattern.permute.xlu0 %v1747_v27 }
 0x2eb   :  { %1498 = vtanh.f32 %v766_v29  ;;  %v782_v15 = vmul.f32 %v1485_v30, %v1299_v28  ;;  %v1974_v29 = vsub.s32 1, %v832_v55 }
 0x2ec   :  { %v1487_v32 = vpop.eup %1486 }
 0x2ed   :  { %v790_v33 = vsel %vm190_vm0, %v782_v15, 0.0  ;;  %v780_v18 = vmul.f32 %v1487_v32, %v1299_v28 }
 0x2ee   :  { %v1489_v34 = vpop.eup %1488  ;;  %791 = vadd.xlane.f32.xlu1 %v790_v33 }
 0x2ef   :  { %v784_v35 = vsel %vm190_vm0, %v780_v18, 0.0  ;;  %v783_v36 = vmul.f32 %v1489_v34, %v1299_v28 }
 0x2f0   :  { %v1491_v22 = vpop.eup %1490  ;;  %785 = vadd.xlane.f32.xlu0 %v784_v35 }
 0x2f1   :  { %v793_v37 = vsel %vm190_vm0, %v783_v36, 0.0  ;;  %v781_v38 = vmul.f32 %v1491_v22, %v1299_v28  ;;  %v1972_v28 = vsub.s32 0, %v832_v55 }
 0x2f2   :  { %794 = vadd.xlane.f32.xlu1 %v793_v37  ;;  %v1493_v24 = vpop.eup %1492 }
 0x2f3   :  { %v787_v39 = vsel %vm190_vm0, %v781_v38, 0.0  ;;  %v805_v45 = vmul.f32 %v1493_v24, %v1300_v41 }
 0x2f4   :  { %v1495_v40 = vpop.eup %1494  ;;  %788 = vadd.xlane.f32.xlu0 %v787_v39 }
 0x2f5   :  { %v803_v42 = vmul.f32 %v1495_v40, %v1300_v41  ;;  %v813_v48 = vsel %vm190_vm0, %v805_v45, 0.0 }
 0x2f6   :  { %v1497_v43 = vpop.eup %1496 }
 0x2f7   :  { %v807_v44 = vsel %vm190_vm0, %v803_v42, 0.0  ;;  %v806_v50 = vmul.f32 %v1497_v43, %v1300_v41 }
 0x2f8   :  { %v1499_v46 = vpop.eup %1498  ;;  %808 = vadd.xlane.f32.xlu0 %v807_v44 }
 0x2f9   :  { %v804_v47 = vmul.f32 %v1499_v46, %v1300_v41  ;;  %v816_v51 = vsel %vm190_vm0, %v806_v50, 0.0 }
 0x2fb   :  { %v810_v49 = vsel %vm190_vm0, %v804_v47, 0.0 }
 0x2fc   :  { %814 = vadd.xlane.f32.xlu0 %v813_v48  ;;  %811 = vadd.xlane.f32.xlu1 %v810_v49 }
 0x300   :  { %817 = vadd.xlane.f32.xlu1 %v816_v51 }
 0x377   :  { %v792_v56 = vpop.xlane.xlu1 %791 }
 0x378   :  { %v845_v63 = vrot.slane %v792_v56, %v1954_v59 }
 0x379   :  { %v786_v58 = vpop.xlane.xlu0 %785 }
 0x37a   :  { %v834_v0 = vrot.slane %v786_v58, %v1954_v59 }
 0x37b   :  { %v795_v60 = vpop.xlane.xlu1 %794 }
 0x37c   :  { %v849_v61 = vrot.slane %v795_v60, %v1951_v57 }
 0x37d   :  { %v789_v62 = vpop.xlane.xlu0 %788 }
 0x37e   :  { %v839_v1 = vrot.slane %v789_v62, %v1951_v57  ;;  %v850_v5 = vsel %vm840_vm3, %v849_v61, %v845_v63 }
 0x380   :  { %v841_v4 = vsel %vm840_vm3, %v839_v1, %v834_v0 }
 0x381   :  { %v809_v6 = vpop.xlane.xlu0 %808  ;;  %v852_v8 = vsel %vm851_vm4, %v850_v5, %v841_v4  ;;  %v1301_v5 = vsel %vm821_vm6, 1.0, %v1745_v10 }
 0x382   :  { %v855_v11 = vsel %vm854_vm5, %v852_v8, -inf  ;;  %v925_v17 = vrot.slane %v809_v6, %v1954_v59 }
 0x383   :  { %856 = vmax.xlane.f32.xlu0 %v855_v11 }
 0x385   :  { %v812_v12 = vpop.xlane.xlu1 %811  ;;  %v815_v13 = vpop.xlane.xlu0 %814 }
 0x386   :  { %v929_v14 = vrot.slane %v812_v12, %v1951_v57  ;;  %v934_v19 = vrot.slane %v815_v13, %v1954_v59 }
 0x388   :  { %v930_v21 = vsel %vm840_vm3, %v929_v14, %v925_v17 }
 0x389   :  { %v818_v16 = vpop.xlane.xlu1 %817 }
 0x38a   :  { %v938_v20 = vrot.slane %v818_v16, %v1951_v57 }
 0x38c   :  { %v939_v23 = vsel %vm840_vm3, %v938_v20, %v934_v19 }
 0x38d   :  { %v940_v25 = vsel %vm851_vm4, %v939_v23, %v930_v21 }
 0x38e   :  { %v942_v26 = vsel %vm854_vm5, %v940_v25, -inf }
 0x38f   :  { %943 = vmax.xlane.f32.xlu1 %v942_v26  ;;  %v1302_v26 = vsel %vm824_vm7, 1.0, %v1745_v10 }
 0x40c   :  { %v857_v30 = vpop.xlane.xlu0 %856 }
 0x40d   :  { %v862_v31 = vrot.slane %v857_v30, %v1972_v28  ;;  %v866_v15 = vrot.slane %v857_v30, %v1974_v29 }
 0x40f   :  { %v869_v32 = vsub.f32 %v786_v58, %v862_v31  ;;  %v870_v33 = vsub.f32 %v789_v62, %v862_v31  ;;  %v871_v18 = vsub.f32 %v792_v56, %v866_v15  ;;  %v872_v36 = vsub.f32 %v795_v60, %v866_v15 }
 0x411   :  { %v873_v34 = vmul.f32 1.442695, %v869_v32  ;;  %v875_v35 = vmul.f32 1.442695, %v870_v33  ;;  %v877_v22 = vmul.f32 1.442695, %v871_v18 }
 0x412   :  { %v879_v37 = vmul.f32 1.442695, %v872_v36 }
 0x413   :  { %1500 = vpow2.f32 %v873_v34 }
 0x414   :  { %1502 = vpow2.f32 %v875_v35 }
 0x415   :  { %1504 = vpow2.f32 %v877_v22 }
 0x416   :  { %1506 = vpow2.f32 %v879_v37 }
 0x418   :  { %v944_v38 = vpop.xlane.xlu1 %943 }
 0x419   :  { %v949_v24 = vrot.slane %v944_v38, %v1972_v28  ;;  %v953_v40 = vrot.slane %v944_v38, %v1974_v29  ;;  %v1460_v38 = vld [vmem:[#allocation14 + $0x8] sm:$0xff]  }
 0x41a   :  { %1418 = vmatpush3.bf16.msra.mxu1 %v1460_v38 }
 0x41b   :  { %v956_v39 = vsub.f32 %v809_v6, %v949_v24  ;;  %v957_v41 = vsub.f32 %v812_v12, %v949_v24  ;;  %v958_v44 = vsub.f32 %v815_v13, %v953_v40  ;;  %v959_v47 = vsub.f32 %v818_v16, %v953_v40  ;;  %v1461_v24 = vld [vmem:[#allocation14] sm:$0xff]   ;;  %1419 = vmatprep.subr.bf16.mxu1 %v1745_v10 }
 0x41c   :  { %v1037_v40 = vunpack.c.l.bf16 %v1862_v7 }
 0x41d   :  { %v960_v42 = vmul.f32 1.442695, %v956_v39  ;;  %v962_v45 = vmul.f32 1.442695, %v957_v41  ;;  %v964_v48 = vmul.f32 1.442695, %v958_v44  ;;  %v1038_v39 = vunpack.c.h.bf16 %v1862_v7 }
 0x41e   :  { %v966_v50 = vmul.f32 1.442695, %v959_v47  ;;  %1420 = vmatpush3.bf16.msra.mxu1 %v1461_v24  ;;  %v1039_v44 = vunpack.c.l.bf16 %v1868_v9 }
 0x41f   :  { %1508 = vpow2.f32 %v960_v42 }
 0x420   :  { %v1501_v43 = vpop.eup %1500  ;;  %1510 = vpow2.f32 %v962_v45 }
 0x421   :  { %v1503_v46 = vpop.eup %1502  ;;  %886 = vperm.xlu0 %1448, %v1501_v43   ;;  %1512 = vpow2.f32 %v964_v48 }
 0x422   :  { %889 = vperm.xlu1 %1449, %v1503_v46   ;;  %v1505_v49 = vpop.eup %1504  ;;  %1514 = vpow2.f32 %v966_v50 }
 0x423   :  { %v1507_v51 = vpop.eup %1506 }
 0x426   :  { %892 = vperm.xlu1 %1449, %v1505_v49  }
 0x42a   :  { %895 = vperm.xlu1 %1449, %v1507_v51  }
 0x42c   :  { %v1509_v52 = vpop.eup %1508 }
 0x42d   :  { %v1511_v54 = vpop.eup %1510 }
 0x42e   :  { %973 = vperm.xlu1 %1449, %v1509_v52   ;;  %v1513_v55 = vpop.eup %1512 }
 0x42f   :  { %v1515_v56 = vpop.eup %1514 }
 0x432   :  { %976 = vperm.xlu1 %1449, %v1511_v54  }
 0x436   :  { %979 = vperm.xlu1 %1449, %v1513_v55  }
 0x43a   :  { %982 = vperm.xlu1 %1449, %v1515_v56   ;;  %v1085_v56 = vunpack.c.l.bf16 %v1854_v2 }
 0x49c   :  { %v887_v60 = vpop.permute.xlu0 %886 }
 0x49d   :  { %v890_v58 = vpop.permute.xlu1 %889  ;;  %v900_v62 = vrot.slane %v887_v60, %v1954_v59 }
 0x49e   :  { %v904_v63 = vrot.slane %v890_v58, %v1951_v57  ;;  %v1086_v58 = vunpack.c.h.bf16 %v1854_v2 }
 0x4a0   :  { %v905_v6 = vsel %vm840_vm3, %v904_v63, %v900_v62 }
 0x4a1   :  { %v893_v61 = vpop.permute.xlu1 %892 }
 0x4a2   :  { %v909_v1 = vrot.slane %v893_v61, %v1954_v59 }
 0x4a5   :  { %v896_v0 = vpop.permute.xlu1 %895 }
 0x4a6   :  { %v913_v4 = vrot.slane %v896_v0, %v1951_v57 }
 0x4a8   :  { %v914_v8 = vsel %vm840_vm3, %v913_v4, %v909_v1  ;;  %v1087_v1 = vunpack.c.l.bf16 %v1856_v3  ;;  %v1088_v4 = vunpack.c.h.bf16 %v1856_v3 }
 0x4a9   :  { %v974_v11 = vpop.permute.xlu1 %973  ;;  %v915_v12 = vsel %vm851_vm4, %v914_v8, %v905_v6 }
 0x4aa   :  { %v917_v13 = vmul.f32 %v1301_v5, %v915_v12  ;;  %v987_v21 = vrot.slane %v974_v11, %v1954_v59 }
 0x4ac   :  { %v1005_v14 = vsel %vm854_vm5, %v917_v13, 0.0 }
 0x4ad   :  { %1006 = vadd.xlane.f32.xlu1 %v1005_v14  ;;  %v977_v16 = vpop.permute.xlu1 %976 }
 0x4ae   :  { %v991_v19 = vrot.slane %v977_v16, %v1951_v57 }
 0x4b0   :  { %v992_v27 = vsel %vm840_vm3, %v991_v19, %v987_v21 }
 0x4b1   :  { %v980_v17 = vpop.permute.xlu1 %979 }
 0x4b2   :  { %v996_v23 = vrot.slane %v980_v17, %v1954_v59 }
 0x4b5   :  { %v983_v20 = vpop.permute.xlu1 %982 }
 0x4b6   :  { %v1000_v25 = vrot.slane %v983_v20, %v1951_v57 }
 0x4b8   :  { %v1001_v30 = vsel %vm840_vm3, %v1000_v25, %v996_v23 }
 0x4b9   :  { %v1002_v31 = vsel %vm851_vm4, %v1001_v30, %v992_v27 }
 0x4ba   :  { %v1004_v15 = vmul.f32 %v1302_v26, %v1002_v31 }
 0x4bc   :  { %v1010_v32 = vsel %vm854_vm5, %v1004_v15, 0.0 }
 0x4bd   :  { %1011 = vadd.xlane.f32.xlu0 %v1010_v32 }
 0x536   :  { %v1007_v53 = vpop.xlane.xlu1 %1006 }
 0x537   :  { %1516 = vrcp.f32 %v1007_v53 }
 0x544   :  { %v1517_v33 = vpop.eup %1516 }
 0x545   :  { %v1009_v18 = vmul.f32 %v1517_v33, %v917_v13 }
 0x546   :  { %v1012_v34 = vpop.xlane.xlu0 %1011 }
 0x547   :  { %1518 = vrcp.f32 %v1012_v34  ;;  %v1018_v57 = vrot.slane %v1009_v18, %v1972_v28  ;;  %v1029_v59 = vrot.slane %v1009_v18, %v1974_v29 }
 0x549   :  { %1024 = vbcast.lane.b32.xlu1 %v1018_v57, 264  ;;  %1020 = vbcast.lane.b32.xlu0 %v1018_v57, 256 }
 0x54d   :  { %1031 = vbcast.lane.b32.xlu1 %v1029_v59, 256  ;;  %1035 = vbcast.lane.b32.xlu0 %v1029_v59, 264 }
 0x554   :  { %v1519_v35 = vpop.eup %1518 }
 0x555   :  { %v1014_v36 = vmul.f32 %v1519_v35, %v1004_v15 }
 0x557   :  { %v1066_v22 = vrot.slane %v1014_v36, %v1972_v28  ;;  %v1077_v37 = vrot.slane %v1014_v36, %v1974_v29  ;;  %v1040_v29 = vunpack.c.h.bf16 %v1868_v9 }
 0x559   :  { %1068 = vbcast.lane.b32.xlu1 %v1066_v22, 256  ;;  %1072 = vbcast.lane.b32.xlu0 %v1066_v22, 264 }
 0x55d   :  { %1079 = vbcast.lane.b32.xlu1 %v1077_v37, 256  ;;  %1083 = vbcast.lane.b32.xlu0 %v1077_v37, 264 }
 0x5bb   :  { %v1025_v41 = vpop.permute.xlu1 %1024  ;;  %v1021_v42 = vpop.permute.xlu0 %1020 }
 0x5bc   :  { %v1042_v43 = vmul.f32 %v1038_v39, %v1025_v41  ;;  %v1041_v28 = vmul.f32 %v1037_v40, %v1021_v42 }
 0x5be   :  { %v1046_v47 = vsel %vm190_vm0, %v1042_v43, 0.0  ;;  %v1045_v48 = vsel %vm190_vm0, %v1041_v28, 0.0  ;;  %v1462_v28 = vld [vmem:[%s2046_s9 + $0x8] sm:$0xff]  }
 0x5bf   :  { %v1032_v45 = vpop.permute.xlu1 %1031  ;;  %v1036_v46 = vpop.permute.xlu0 %1035  ;;  %v1047_v51 = vadd.f32 %v1046_v47, %v1045_v48  ;;  %1426 = vmatpush3.bf16.msra.mxu0 %v1462_v28 }
 0x5c0   :  { %v1043_v49 = vmul.f32 %v1039_v44, %v1032_v45  ;;  %v1044_v50 = vmul.f32 %v1040_v29, %v1036_v46  ;;  %1427 = vmatprep.subr.bf16.mxu0 %v1745_v10  ;;  %v1463_v44 = vld [vmem:[%s2046_s9] sm:$0xff]   ;;  %s1702_s9 = scalar_lea.vmem %s1263_s26, 32 }
 0x5c1   :  { %v1048_v54 = vrot.slane %v1047_v51, 4  ;;  %v1303_v29 = vld [vmem:[#allocation16] ss:$0 sm:$0xff]  ;;  %v1307_v10 = vld [vmem:[%s2047_s10] ss:$0 sm:$0xff]  ;;  %p1703_p3 = scmp.ne.s32.totalorder %s1263_s26, %s1702_s9  ;;  %p1708_p5 = scmp.lt.s32.totalorder %s1702_s9, %s1702_s9 }
 0x5c2   :  { %v1054_v52 = vsel %vm190_vm0, %v1043_v49, 0.0  ;;  %v1055_v7 = vsel %vm190_vm0, %v1044_v50, 0.0 }
 0x5c3   :  { %v1056_v55 = vadd.f32 %v1055_v7, %v1054_v52  ;;  %v1049_v9 = vadd.f32 %v1048_v54, %v1047_v51  ;;  %1428 = vmatpush3.bf16.msra.mxu0 %v1463_v44  ;;  %p1709_p6 = por %p1708_p5, %p1707_p4 }
 0x5c5   :  { %v1057_v60 = vrot.slane %v1056_v55, 4  ;;  %v1050_v8 = vrot.slane %v1049_v9, 2  ;;  %p1710_p7 = pnand %p1709_p6, %p1703_p3 }
 0x5c7   :  { %v1058_v11 = vadd.f32 %v1057_v60, %v1056_v55  ;;  %v1051_v21 = vadd.f32 %v1050_v8, %v1049_v9 }
 0x5c9   :  { %v1059_v23 = vrot.slane %v1058_v11, 2  ;;  %v1052_v30 = vrot.slane %v1051_v21, 1 }
 0x5cb   :  { %v1069_v61 = vpop.permute.xlu1 %1068  ;;  %v1073_v62 = vpop.permute.xlu0 %1072  ;;  %v1060_v31 = vadd.f32 %v1059_v23, %v1058_v11  ;;  %v1053_v18 = vadd.f32 %v1052_v30, %v1051_v21 }
 0x5cc   :  { %v1089_v63 = vmul.f32 %v1085_v56, %v1069_v61  ;;  %v1090_v0 = vmul.f32 %v1086_v58, %v1073_v62 }
 0x5cd   :  { %v1061_v34 = vrot.slane %v1060_v31, 1 }
 0x5ce   :  { %v1093_v5 = vsel %vm190_vm0, %v1089_v63, 0.0  ;;  %v1094_v6 = vsel %vm190_vm0, %v1090_v0, 0.0 }
 0x5cf   :  { %v1095_v12 = vadd.f32 %v1094_v6, %v1093_v5  ;;  %v1080_v13 = vpop.permute.xlu1 %1079  ;;  %v1084_v14 = vpop.permute.xlu0 %1083  ;;  %v1062_v22 = vadd.f32 %v1061_v34, %v1060_v31 }
 0x5d0   :  { %v1091_v2 = vmul.f32 %v1087_v1, %v1080_v13  ;;  %v1092_v16 = vmul.f32 %v1088_v4, %v1084_v14 }
 0x5d1   :  { %v1096_v17 = vrot.slane %v1095_v12, 4 }
 0x5d2   :  { %v1102_v19 = vsel %vm190_vm0, %v1091_v2, 0.0  ;;  %v1103_v20 = vsel %vm190_vm0, %v1092_v16, 0.0 }
 0x5d3   :  { %v1097_v25 = vadd.f32 %v1096_v17, %v1095_v12  ;;  %v1104_v3 = vadd.f32 %v1103_v20, %v1102_v19 }
 0x5d5   :  { %v1098_v26 = vrot.slane %v1097_v25, 2  ;;  %v1105_v27 = vrot.slane %v1104_v3, 4 }
 0x5d7   :  { %v1099_v15 = vadd.f32 %v1098_v26, %v1097_v25  ;;  %v1106_v32 = vadd.f32 %v1105_v27, %v1104_v3 }
 0x5d9   :  { %v1100_v53 = vrot.slane %v1099_v15, 1  ;;  %v1107_v33 = vrot.slane %v1106_v32, 2 }
 0x5db   :  { %v1101_v57 = vadd.f32 %v1100_v53, %v1099_v15  ;;  %v1108_v59 = vadd.f32 %v1107_v33, %v1106_v32 }
 0x5dd   :  { %v1111_v35 = vadd.f32 %v1101_v57, %v1053_v18  ;;  %v1109_v36 = vrot.slane %v1108_v59, 1 }
 0x5df   :  { %v1110_v37 = vadd.f32 %v1109_v36, %v1108_v59  ;;  %v1113_v38 = vpack.c.bf16 %v1111_v35, %v1111_v35 }
 0x5e1   :  { %v1112_v24 = vadd.f32 %v1110_v37, %v1062_v22  ;;  %v1128_v40 = vunpack.c.l.b16 %v1113_v38 }
 0x5e3   :  { %v1114_v39 = vpack.c.bf16 %v1112_v24, %v1112_v24 }
 0x5e5   :  { %v1129_v41 = vunpack.c.l.b16 %v1114_v39 }
 0x5e7   :  { %v1130_v42 = vsel %vm851_vm4, %v1129_v41, %v1128_v40 }
 0x5e8   :  { %v1131_v43 = vpack.c.b16 %v1130_v42, %v1130_v42 }
 0x5ea   :  { %1422 = vmatmul.mubr.msk.bf16.vlgmr.msra.gmra.mxu1 %vm190_vm0, %v1131_v43 }
 0x6aa   :  { %v1181_v45 = vpop.f32.mrf.mxu1 }
 0x6ab   :  { %v1182_v46 = vadd.f32 %v1303_v29, %v1181_v45 }
 0x6ac   :  { %v1423_v47 = vpop.f32.mrf.mxu1 }
 0x6ad   :  { %1520 = vtanh.f32 %v1182_v46 }
 0x6ae   :  { %v1184_v48 = vpop.f32.mrf.mxu1 }
 0x6b0   :  { %v1424_v49 = vpop.f32.mrf.mxu1 }
 0x6ba   :  { %v1521_v50 = vpop.eup %1520 }
 0x6bb   :  { %v1188_v51 = vpack.c.bf16 %v1521_v50, %v1521_v50 }
 0x6bd   :  { %1430 = vmatmul.mubr.msk.bf16.vlgmr.msra.gmra.mxu0 %vm190_vm0, %v1188_v51 }
 0x77d   :  { %v1249_v52 = vpop.f32.mrf.mxu0 }
 0x77e   :  { %v1250_v7 = vadd.f32 %v1307_v10, %v1249_v52 }
 0x77f   :  { %v1431_v54 = vpop.f32.mrf.mxu0 }
 0x780   :  { %1255 = vst [vmem:[#allocation17] sm:$0x3] %v1250_v7 }
 0x781   :  { %v1252_v55 = vpop.f32.mrf.mxu0 }
 0x782   :  { %1713 = shalt.err (!%p1710_p7)
}
 0x783   :  { %1265 = dma.vmem_to_hbm [thread:$0]  %s1263_s26, 32, %s2048_s11, [#allocation4]   ;;  %v1432_v56 = vpop.f32.mrf.mxu0 }
 0x784   :  { %1732 = dma.done.wait [#allocation4], 32  }
 0x785   :  { %1733 = vsyncadd [#allocation4], 4294967264 }
 0x786   :  { %1269 = vsyncpa [#allocation3], 1 }
 0x787   :  { %1270 = vsyncpa [#allocation6], 1 }
 0x788   :  { %1271 = vsyncpa [#allocation9], 1 }
 0x789   :  { %1272 = vsyncpa [#allocation12], 1 }
 0x78a   :  { %1273 = vsyncpa [#allocation15], 1 }
 0x78b   :  { %1274 = vsyncpa [#allocation4], 1 }

</bundles_post_ra>
